<compile_context>
chip_gen: v7x
topology: tpu7x:2x2x1
jax: 0.10.0
libtpu: 0.0.40
codegen_flags: <defaults>
</compile_context>

<pallas_src>
import functools
import math

import jax
import jax.numpy as jnp
from jax.experimental import pallas as pl
from jax.experimental.pallas import tpu as pltpu

_LANES = 128
_SUBLANES = 8
_TARGET_STEPS = 8          # >= 8 grid steps: pipelining + v7x 2-TC load balance
_DEFAULT_EPS = 1e-5


def _round_up(n, m):
    return ((n + m - 1) // m) * m


def _ln_kernel_bias(x_ref, w_ref, b_ref, o_ref, *, inv_h, eps):
    # x_ref: (row_tile, hidden); w_ref/b_ref: (1, hidden)
    x = x_ref[...].astype(jnp.float32)
    # Two-pass variance over the VMEM-resident tile: exact match to
    # F.layer_norm and no E[x^2]-E[x]^2 cancellation.  vld/VALU have slack
    # under the HBM-bound roofline, so the second pass is free.
    mean = jnp.sum(x, axis=-1, keepdims=True) * inv_h
    d = x - mean
    var = jnp.sum(d * d, axis=-1, keepdims=True) * inv_h
    inv = jax.lax.rsqrt(var + eps)
    y = d * inv * w_ref[...].astype(jnp.float32) + b_ref[...].astype(jnp.float32)
    o_ref[...] = y.astype(o_ref.dtype)


def _ln_kernel_nobias(x_ref, w_ref, o_ref, *, inv_h, eps):
    x = x_ref[...].astype(jnp.float32)
    mean = jnp.sum(x, axis=-1, keepdims=True) * inv_h
    d = x - mean
    var = jnp.sum(d * d, axis=-1, keepdims=True) * inv_h
    inv = jax.lax.rsqrt(var + eps)
    y = d * inv * w_ref[...].astype(jnp.float32)
    o_ref[...] = y.astype(o_ref.dtype)


def _vmem_capacity_bytes():
    """Per-TensorCore VMEM capacity, generation-aware and clamped."""
    kind = ""
    try:
        kind = jax.devices()[0].device_kind.lower()
    except Exception:
        pass
    # 64 MiB per TC on v7x; 128 MiB on v5e/v6e.  Unknown generation -> assume
    # the smaller size (safe everywhere).
    if kind and ("v7" not in kind):
        per_tc = 128 * 1024 * 1024
    else:
        per_tc = 64 * 1024 * 1024
    try:
        cap = getattr(pltpu.get_tpu_info(), "vmem_capacity_bytes", None)
        if cap:
            # Guard against the query reporting a per-chip (2-TC) number.
            return min(int(cap), per_tc)
    except Exception:
        pass
    return per_tc


def layer_norm(x, weight, bias=None, *, eps=_DEFAULT_EPS):
    """LayerNorm over the last dim of x. weight/bias have shape (hidden,).

    bias=None mirrors the PyTorch `bias=False` path (no bias add at all).
    """
    orig_shape = x.shape
    hidden = orig_shape[-1]
    rows = int(math.prod(orig_shape[:-1])) if len(orig_shape) > 1 else 1
    x2 = x.reshape(rows, hidden)            # contiguous reshape: no copy
    w2 = weight.reshape(1, hidden)
    b2 = bias.reshape(1, hidden) if bias is not None else None

    itemsize = jnp.dtype(x.dtype).itemsize
    cap = _vmem_capacity_bytes()            # per-TC: 64 MiB v7x, 128 MiB v5e/v6e
    budget = int(cap * 0.5)                 # headroom for pipelining / regalloc

    # Per-row VMEM footprint: double-buffered input + output tiles in x.dtype
    # (2x each) plus ~3 full-tile f32 temporaries inside the kernel
    # (x upcast, x-mean, squared/scaled result) — matters for bf16 inputs.
    bytes_per_row = hidden * (4 * itemsize + 3 * 4)
    row_tile = (budget // max(bytes_per_row, 1)) // _SUBLANES * _SUBLANES
    # Cap near the measured mem-bound roofline knee (512-1024); bigger tiles
    # only add VMEM pressure.
    row_tile = max(_SUBLANES, min(1024, row_tile))
    if rows <= _SUBLANES:
        # Tiny problem: one full-extent block (allowed by the (8,128) rule).
        row_tile = rows
    else:
        # Target >= _TARGET_STEPS grid steps so DMAs/compute overlap and the
        # two v7x TensorCores both get several tiles.
        row_tile = min(row_tile,
                       max(_SUBLANES,
                           _round_up(pl.cdiv(rows, _TARGET_STEPS), _SUBLANES)))
        row_tile = min(row_tile, _round_up(rows, _SUBLANES))
    grid = (pl.cdiv(rows, row_tile),)       # ragged last tile: rows independent

    inv_h = 1.0 / float(hidden)
    if b2 is not None:
        kernel = functools.partial(_ln_kernel_bias, inv_h=inv_h, eps=float(eps))
        in_specs = [
            pl.BlockSpec((row_tile, hidden), lambda i: (i, 0)),
            pl.BlockSpec((1, hidden), lambda i: (0, 0)),
            pl.BlockSpec((1, hidden), lambda i: (0, 0)),
        ]
        args = (x2, w2, b2)
    else:
        kernel = functools.partial(_ln_kernel_nobias, inv_h=inv_h, eps=float(eps))
        in_specs = [
            pl.BlockSpec((row_tile, hidden), lambda i: (i, 0)),
            pl.BlockSpec((1, hidden), lambda i: (0, 0)),
        ]
        args = (x2, w2)

    n_params = 2 if b2 is not None else 1
    cost = pl.CostEstimate(
        flops=int(7 * rows * hidden),
        transcendentals=int(rows),
        bytes_accessed=int(2 * rows * hidden * itemsize
                           + n_params * hidden * jnp.dtype(weight.dtype).itemsize),
    )

    out = pl.pallas_call(
        kernel,
        out_shape=jax.ShapeDtypeStruct((rows, hidden), x.dtype),
        grid_spec=pltpu.PrefetchScalarGridSpec(
            num_scalar_prefetch=0,
            grid=grid,
            in_specs=in_specs,
            out_specs=pl.BlockSpec((row_tile, hidden), lambda i: (i, 0)),
        ),
        compiler_params=pltpu.CompilerParams(
            dimension_semantics=("parallel",),
            vmem_limit_bytes=int(cap * 0.8),
        ),
        cost_estimate=cost,
    )(*args)

    return out.reshape(orig_shape)


def _reference(x, weight, bias, eps=_DEFAULT_EPS):
    mean = jnp.mean(x, axis=-1, keepdims=True)
    var = jnp.mean((x - mean) ** 2, axis=-1, keepdims=True)
    y = (x - mean) * jax.lax.rsqrt(var + eps) * weight
    if bias is not None:
        y = y + bias
    return y


if __name__ == "__main__":
    key = jax.random.PRNGKey(0)
    k0, k1, k2, k3 = jax.random.split(key, 4)

    # Small shapes consistent with the module's call sites (B, T, C).
    batch, seq, hidden = 2, 8, 32
    x = jax.random.normal(k0, (batch, seq, hidden), dtype=jnp.float32)
    weight = 1.0 + 0.1 * jax.random.normal(k1, (hidden,), dtype=jnp.float32)
    bias = 0.1 * jax.random.normal(k2, (hidden,), dtype=jnp.float32)

    # bias=True path (hidden=32, NOT a multiple of 128: full-extent last dim).
    y = jax.block_until_ready(layer_norm(x, weight, bias))
    y_ref = _reference(x, weight, bias)
    assert jnp.allclose(y, y_ref, atol=1e-5, rtol=1e-5), "mismatch (bias=True)"

    # bias=False path (bias-free kernel variant).
    y_nb = jax.block_until_ready(layer_norm(x, weight, None))
    y_nb_ref = _reference(x, weight, None)
    assert jnp.allclose(y_nb, y_nb_ref, atol=1e-5, rtol=1e-5), "mismatch (bias=False)"

    # Lane-dense (already multiple of 128) path.
    hidden2 = 128
    x2 = jax.random.normal(k3, (batch, seq, hidden2), dtype=jnp.float32)
    w2 = jnp.ones((hidden2,), dtype=jnp.float32)
    b2 = jnp.zeros((hidden2,), dtype=jnp.float32)
    y2 = jax.block_until_ready(layer_norm(x2, w2, b2))
    y2_ref = _reference(x2, w2, b2)
    assert jnp.allclose(y2, y2_ref, atol=1e-5, rtol=1e-5), "mismatch (hidden=128)"

    print("KERNEL_OK")
</pallas_src>

<mosaic_0001>
module attributes {stable_mosaic.version = 11 : i64} {
  func.func @_ln_kernel_bias(%arg0: i32, %arg1: memref<8x32xf32, #tpu.memory_space<vmem>>, %arg2: memref<1x32xf32, #tpu.memory_space<vmem>>, %arg3: memref<1x32xf32, #tpu.memory_space<vmem>>, %arg4: memref<8x32xf32, #tpu.memory_space<vmem>>) attributes {dimension_semantics = [#tpu.dimension_semantics<parallel>], iteration_bounds = array<i64: 2>, scalar_prefetch = 0 : i64, scratch_operands = 0 : i64, tpu.core_type = #tpu.core_type<tc>, window_params = [{transform_indices = @transform_0, window_bounds = array<i64: 8, 32>}, {pipeline_mode = #tpu.pipeline_mode<synchronous>, transform_indices = @transform_1, window_bounds = array<i64: 1, 32>}, {pipeline_mode = #tpu.pipeline_mode<synchronous>, transform_indices = @transform_2, window_bounds = array<i64: 1, 32>}, {transform_indices = @transform_3, window_bounds = array<i64: 8, 32>}]} {
    %c0 = arith.constant 0 : index
    %c0_0 = arith.constant 0 : index
    %0 = vector.load %arg1[%c0, %c0_0] : memref<8x32xf32, #tpu.memory_space<vmem>>, vector<8x32xf32>
    %cst = arith.constant dense<0.000000e+00> : vector<8xf32>
    %1 = vector.multi_reduction <add>, %0, %cst [1] : vector<8x32xf32> to vector<8xf32>
    %2 = vector.shape_cast %1 : vector<8xf32> to vector<8x1xf32>
    %cst_1 = arith.constant 3.125000e-02 : f32
    %3 = vector.broadcast %cst_1 : f32 to vector<8x1xf32>
    %4 = arith.mulf %2, %3 : vector<8x1xf32>
    %5 = vector.broadcast %4 : vector<8x1xf32> to vector<8x32xf32>
    %6 = arith.subf %0, %5 : vector<8x32xf32>
    %7 = arith.mulf %6, %6 : vector<8x32xf32>
    %cst_2 = arith.constant dense<0.000000e+00> : vector<8xf32>
    %8 = vector.multi_reduction <add>, %7, %cst_2 [1] : vector<8x32xf32> to vector<8xf32>
    %9 = vector.shape_cast %8 : vector<8xf32> to vector<8x1xf32>
    %cst_3 = arith.constant 3.125000e-02 : f32
    %10 = vector.broadcast %cst_3 : f32 to vector<8x1xf32>
    %11 = arith.mulf %9, %10 : vector<8x1xf32>
    %cst_4 = arith.constant 9.99999974E-6 : f32
    %12 = vector.broadcast %cst_4 : f32 to vector<8x1xf32>
    %13 = arith.addf %11, %12 : vector<8x1xf32>
    %14 = math.rsqrt %13 : vector<8x1xf32>
    %15 = vector.broadcast %14 : vector<8x1xf32> to vector<8x32xf32>
    %16 = arith.mulf %6, %15 : vector<8x32xf32>
    %c0_5 = arith.constant 0 : index
    %c0_6 = arith.constant 0 : index
    %17 = vector.load %arg2[%c0_5, %c0_6] : memref<1x32xf32, #tpu.memory_space<vmem>>, vector<1x32xf32>
    %18 = vector.broadcast %17 : vector<1x32xf32> to vector<8x32xf32>
    %19 = arith.mulf %16, %18 : vector<8x32xf32>
    %c0_7 = arith.constant 0 : index
    %c0_8 = arith.constant 0 : index
    %20 = vector.load %arg3[%c0_7, %c0_8] : memref<1x32xf32, #tpu.memory_space<vmem>>, vector<1x32xf32>
    %21 = vector.broadcast %20 : vector<1x32xf32> to vector<8x32xf32>
    %22 = arith.addf %19, %21 : vector<8x32xf32>
    %c0_9 = arith.constant 0 : index
    %c0_10 = arith.constant 0 : index
    %23 = vector.load %arg4[%c0_9, %c0_10] : memref<8x32xf32, #tpu.memory_space<vmem>>, vector<8x32xf32>
    tpu.vector_store %arg4[%c0_9, %c0_10], %22 {strides = array<i32>} : memref<8x32xf32, #tpu.memory_space<vmem>>, vector<8x32xf32>,
    return
  }
  func.func @transform_0(%arg0: i32) -> (i32, i32) {
    %c0_i32 = arith.constant 0 : i32
    %c0_i32_0 = arith.constant 0 : i32
    return %arg0, %c0_i32 : i32, i32
  }
  func.func @transform_1(%arg0: i32) -> (i32, i32) {
    %c0_i32 = arith.constant 0 : i32
    %c0_i32_0 = arith.constant 0 : i32
    %c0_i32_1 = arith.constant 0 : i32
    return %c0_i32, %c0_i32_0 : i32, i32
  }
  func.func @transform_2(%arg0: i32) -> (i32, i32) {
    %c0_i32 = arith.constant 0 : i32
    %c0_i32_0 = arith.constant 0 : i32
    %c0_i32_1 = arith.constant 0 : i32
    return %c0_i32, %c0_i32_0 : i32, i32
  }
  func.func @transform_3(%arg0: i32) -> (i32, i32) {
    %c0_i32 = arith.constant 0 : i32
    %c0_i32_0 = arith.constant 0 : i32
    return %arg0, %c0_i32 : i32, i32
  }
}

</mosaic_0001>

<bundles_post_ra>
// kernel: tpu_custom_call.1
= control target key start
LH: loop header
LB: loop body
LE: loop exit
PB: predicated region body
PF: predicated region fallthrough
CT: control target
= control target key end

     0   :  { %8 = vsyncpa [#allocation3], 0  ;;  %s844_s0 = inlined_call_operand.hbm [shape: f32[16,32], index: 0, kind: input, shape index: {}]   ;;  %s845_s1 = inlined_call_operand.hbm [shape: f32[1,32], index: 1, kind: input, shape index: {}]   ;;  %s846_s2 = inlined_call_operand.hbm [shape: f32[1,32], index: 2, kind: input, shape index: {}]   ;;  %s847_s3 = inlined_call_operand.hbm [shape: f32[16,32], index: 3, kind: output, shape index: {}]  }
   0x1   :  { %10 = vsyncpa [#allocation3 + $0x1], 0 }
   0x2   :  { %11 = vsyncpa [#allocation6], 0 }
   0x3   :  { %12 = vsyncpa [#allocation4], 0 }
   0x4   :  { %14 = vsyncpa [#allocation4 + $0x1], 0  ;;  %s615_s12 = smov 0   ;;  %s617_s13 = smov 0  }
   0x5   :  { %s619_s14 = smov 0   ;;  %s621_s15 = smov 0  }
   0x6 LB: > { %s636_s16 = sadd.s32 4294967295, %s589_s15   ;;  %s346_s17 = sadd.s32 4294967294, %s589_s15   ;;  %s589_s15 = sphi %s621_s15, %s867_s15   ;;  %s585_s14 = sphi %s619_s14, %s866_s14   ;;  %s581_s13 = sphi %s617_s13, %s865_s13   ;;  %s577_s12 = sphi %s615_s12, %s864_s12  }
   0x7   : > { %p40_p0 = scmp.ne.s32.totalorder %s581_s13, %s577_s12  ;;  %p848_p1 = scmp.eq.s32.totalorder %s636_s16, 0 }
   0x8   : > { %p112_p3 = scmp.eq.s32.totalorder %s346_s17, 1  ;;  %p347_p5 = scmp.ge.s32.totalorder %s589_s15, 1 }
   0x9   : > { %p645_p4 = por %p848_p1, %p40_p0  ;;  %p119_p7 = scmp.lt.s32.totalorder %s589_s15, 3 }
   0xa   : > { %p650_p6 = por %p112_p3, %p40_p0  ;;  %s591_s21 = smov [#allocation5]  }
   0xb   : > { %s851_s18 = scalar_select %p645_p4, 1, 0 }
   0xc   : > { %s852_s19 = scalar_select %p650_p6, 1, 0 }
   0xd   : > { %p655_p8 = pnand %p347_p5, %p119_p7  ;;  %s132_s22 = sshll.u32 %s591_s21, 4  ;;  %s133_s22 = int_to_ptr.vmem [resolvable:$true] %s132_s22 }
   0xe   : > { %s592_s23 = smov [#allocation7]   ;;  %s671_s26 = sadd.s32 1, %s589_s15  }
   0xf   : > { %s853_s20 = scalar_select %p655_p8, 1, 0 }
  0x10   : > { %p376_p10 = pneg %p655_p8  ;;  %s143_s24 = sshll.u32 %s592_s23, 4  ;;  %s668_s24 = int_to_ptr.vmem [resolvable:$true] %s143_s24 }
  0x11   : > { %s24_s27 = ssub.s32 %s589_s15, %s671_s26  ;;  %s433_s30 = scalar_lea.hbm %s845_s1, 16 }
  0x12   : > { %p664_p11 = pnand %p376_p10, %p848_p1  ;;  %p434_p12 = scmp.ne.s32.totalorder %s845_s1, %s433_s30 }
  0x13   : > { %p440_p5 = scmp.lt.u32.totalorder %s433_s30, %s845_s1 }
  0x14   : > { %p435_p13 = pneg %p664_p11 }
  0x16   : > { %p436_p0 = pnand %p435_p13, %p434_p12 }
  0x18   : > { %p437_p3 = pneg %p436_p0 }
  0x1a   : > { %p442_p7 = pnand %p440_p5, %p437_p3 }
  0x1c   : > { %445 = shalt.err (!%p442_p7)
}
  0x1d   : > { %s446_s8 = scalar_lea.vmem %s133_s22, 16  ;;  %s453_s9 = scalar_lea.vmem %s133_s22, 32 }
  0x1e   : > { %p447_p10 = scmp.ne.s32.totalorder %s133_s22, %s446_s8  ;;  %p454_p2 = scmp.lt.s32.totalorder %s133_s22, %s133_s22 }
  0x1f   : > { %p455_p6 = scmp.lt.s32.totalorder %s453_s9, %s446_s8 }
  0x20   : > { %p449_p9 = pnand %p447_p10, %p435_p13 }
  0x21   : > { %p456_p4 = por %p455_p6, %p454_p2 }
  0x22   : > { %p450_p1 = pneg %p449_p9 }
  0x24   : > { %p457_p8 = pnand %p456_p4, %p450_p1 }
  0x26   : > { %460 = shalt.err (!%p457_p8)
}
  0x27   : > { %379 = dma.hbm_to_vmem [thread:$0]  (!%p664_p11), %s845_s1, 16, %s133_s22, [#allocation6]  }
  0x28   : > { %s461_s23 = scalar_lea.hbm %s846_s2, 16 }
  0x29   : > { %p462_p9 = scmp.ne.s32.totalorder %s846_s2, %s461_s23  ;;  %p468_p4 = scmp.lt.u32.totalorder %s461_s23, %s846_s2 }
  0x2b   : > { %p464_p2 = pnand %p462_p9, %p435_p13 }
  0x2d   : > { %p465_p1 = pneg %p464_p2 }
  0x2f   : > { %p470_p6 = pnand %p468_p4, %p465_p1 }
  0x31   : > { %473 = shalt.err (!%p470_p6)
}
  0x32   : > { %s474_s22 = scalar_lea.vmem %s668_s24, 16  ;;  %s481_s5 = scalar_lea.vmem %s668_s24, 32 }
  0x33   : > { %p475_p8 = scmp.ne.s32.totalorder %s668_s24, %s474_s22  ;;  %p482_p3 = scmp.lt.s32.totalorder %s668_s24, %s668_s24 }
  0x34   : > { %p483_p5 = scmp.lt.s32.totalorder %s481_s5, %s474_s22 }
  0x35   : > { %p477_p12 = pnand %p475_p8, %p435_p13 }
  0x36   : > { %p484_p7 = por %p483_p5, %p482_p3 }
  0x37   : > { %p478_p0 = pneg %p477_p12 }
  0x39   : > { %p485_p10 = pnand %p484_p7, %p478_p0 }
  0x3b   : > { %488 = shalt.err (!%p485_p10)
}
  0x3c   : > { %382 = dma.hbm_to_vmem [thread:$0]  (!%p664_p11), %s846_s2, 16, %s668_s24, [#allocation6]  }
  0x3d   : > { %p25_p13 = scmp.eq.s32.totalorder %s24_s27, 0  ;;  %s27_s8 = sadd.s32 1, %s585_s14 }
  0x3e   : > { %p34_p9 = scmp.ne.s32.totalorder %s585_s14, %s581_s13  ;;  %p35_p2 = scmp.eq.s32.totalorder %s589_s15, 0 }
  0x3f   : > { %s731_s25 = scalar_select %p25_p13, %s585_s14, %s27_s8  }
  0x40   : > { %p36_p1 = por %p35_p2, %p34_p9  ;;  %p855_p4 = scmp.eq.s32.totalorder %s636_s16, 1 }
  0x41   : > { %p393_p8 = scmp.lt.s32.totalorder %s589_s15, 2  ;;  %s154_s10 = sand.u32 1, %s585_s14  }
  0x42   : > { %p735_p6 = por %p855_p4, %p34_p9  ;;  %s351_s11 = sshll.u32 %s154_s10, 3 }
  0x43   : > { %s352_s17 = sshll.u32 %s589_s15, 7  ;;  %s158_s27 = scalar_lea.vmem [#allocation2], %s351_s11 }
  0x44   : > { %s745_s24 = scalar_lea.hbm %s844_s0, %s352_s17  ;;  %s165_s28 = sshll.u32 %s158_s27, 4  ;;  %s747_s28 = int_to_ptr.vmem [resolvable:$true] %s165_s28 }
  0x45   : > { %p749_p11 = pnand %p393_p8, %p36_p1  ;;  %s155_s30 = scalar_lea.sflag [#allocation3], %s154_s10 }
  0x46   : > { %s489_s4 = scalar_lea.hbm %s745_s24, 128  ;;  %s494_s6 = scalar_lea.hbm %s844_s0, 256 }
  0x47   : > { %p490_p12 = scmp.ne.s32.totalorder %s745_s24, %s489_s4  ;;  %p491_p0 = pneg %p749_p11 }
  0x48   : > { %p495_p7 = scmp.lt.u32.totalorder %s745_s24, %s844_s0  ;;  %p496_p10 = scmp.lt.u32.totalorder %s494_s6, %s489_s4 }
  0x49   : > { %p492_p3 = pnand %p491_p0, %p490_p12  ;;  %p498_p9 = scmp.lt.u32.totalorder %s489_s4, %s745_s24 }
  0x4a   : > { %p497_p13 = por %p496_p10, %p495_p7 }
  0x4b   : > { %p493_p5 = pneg %p492_p3 }
  0x4c   : > { %p499_p2 = por %p498_p9, %p497_p13 }
  0x4e   : > { %p500_p1 = pnand %p499_p2, %p493_p5 }
  0x50   : > { %503 = shalt.err (!%p500_p1)
}
  0x51   : > { %s504_s10 = scalar_lea.vmem %s747_s28, 128  ;;  %s593_s11 = smov [#allocation2]  }
  0x52   : > { %p505_p4 = scmp.ne.s32.totalorder %s747_s28, %s504_s10  ;;  %s509_s17 = sshll.u32 %s593_s11, 4  ;;  %s510_s17 = int_to_ptr.vmem [resolvable:$false] %s509_s17 }
  0x53   : > { %s511_s21 = scalar_lea.vmem %s510_s17, 256  ;;  %p512_p3 = scmp.lt.s32.totalorder %s747_s28, %s510_s17 }
  0x54   : > { %p507_p8 = pnand %p505_p4, %p491_p0  ;;  %p513_p7 = scmp.lt.s32.totalorder %s511_s21, %s504_s10 }
  0x56   : > { %p508_p12 = pneg %p507_p8  ;;  %p514_p10 = por %p513_p7, %p512_p3 }
  0x58   : > { %p515_p13 = pnand %p514_p10, %p508_p12 }
  0x5a   : > { %518 = shalt.err (!%p515_p13)
}
  0x5b   : > { %386 = dma.hbm_to_vmem [thread:$0]  (!%p749_p11), %s745_s24, 128, %s747_s28, %s155_s30  }
  0x5c   : > { %p858_p5 = scmp.ne.s32.totalorder %s853_s20, 0 }
  0x5d   : > { %s781_s23 = sand.u32 (!%p858_p5), 1, %s581_s13   ;;  %p859_p0 = scmp.ne.s32.totalorder (!%p858_p5), %s851_s18, 0 }
  0x5e   : > { %174 = sbr.rel (%p858_p5) target bundleno = 433 (0x1b1), region = 32  ;;  %s354_s27 = sshll.u32 (!%p858_p5), %s781_s23, 3 }
  0x5f   : > { %s177_s4 = scalar_lea.sflag (!%p858_p5), [#allocation3], %s781_s23  ;;  %s180_s22 = scalar_lea.vmem (!%p858_p5), [#allocation2], %s354_s27 }
  0x65   : > { %564 = dma.done.wait (%p859_p0), %s177_s4, 128  }
  0x66   : > { %566 = vsyncadd (%p859_p0), %s177_s4, 4294967168  ;;  %p860_p9 = scmp.eq.s32.totalorder %s636_s16, 0 }
  0x68   : > { %568 = dma.done.wait (%p860_p9), [#allocation6], 32   ;;  %p861_p11 = pmov %p860_p9 }
  0x69   : > { %vm212_vm0 = vcmask 261120   ;;  %v211_v0 = vld [vmem:[%s180_s22] sm:$0xff]  ;;  %v358_v11 = vld [vmem:[#allocation5] ss:$0 sm:$0xff]  ;;  %v359_v13 = vld [vmem:[#allocation7] ss:$0 sm:$0xff] }
  0x6a   : > { %570 = vsyncadd (%p861_p11), [#allocation6], 4294967264  ;;  %v213_v1 = vsel %vm212_vm0, %v211_v0, 0.0  ;;  %s361_s18 = sshll.u32 %s636_s16, 7  ;;  %s210_s20 = scalar_lea.vmem [#allocation8], %s354_s27 }
  0x6b   : > { %214 = vadd.xlane.f32.xlu0 %v213_v1  ;;  %s257_s24 = sshll.u32 %s210_s20, 4  ;;  %s799_s30 = scalar_lea.hbm %s847_s3, %s361_s18  ;;  %s801_s24 = int_to_ptr.vmem [resolvable:$true] %s257_s24 }
  0x6c   : > { %s244_s5 = scalar_lea.sflag [#allocation4], %s781_s23  ;;  %s519_s6 = scalar_lea.vmem %s801_s24, 128 }
  0x6d   : > { %p520_p2 = scmp.ne.s32.totalorder %s801_s24, %s519_s6  ;;  %s594_s16 = smov [#allocation8]  }
  0x6e   : > { %s523_s7 = sshll.u32 %s594_s16, 4  ;;  %s524_s7 = int_to_ptr.vmem [resolvable:$false] %s523_s7 }
  0x6f   : > { %p521_p1 = pnand %p520_p2, %p735_p6  ;;  %s525_s8 = scalar_lea.vmem %s524_s7, 256 }
  0x70   : > { %p526_p8 = scmp.lt.s32.totalorder %s801_s24, %s524_s7  ;;  %p527_p12 = scmp.lt.s32.totalorder %s525_s8, %s519_s6 }
  0x71   : > { %p522_p4 = pneg %p521_p1 }
  0x72   : > { %p528_p3 = por %p527_p12, %p526_p8 }
  0x74   : > { %p529_p7 = pnand %p528_p3, %p522_p4 }
  0xf8   : > { %v215_v2 = vpop.xlane.xlu0 %214 }
  0xf9   : > { %v216_v3 = vmul.f32 0.03125, %v215_v2 }
  0xfb   : > { %v217_v4 = vsub.f32 %v211_v0, %v216_v3 }
  0xfd   : > { %v218_v5 = vmul.f32 %v217_v4, %v217_v4 }
  0xff   : > { %v219_v6 = vsel %vm212_vm0, %v218_v5, 0.0 }
 0x100   : > { %220 = vadd.xlane.f32.xlu0 %v219_v6 }
 0x18d   : > { %v221_v7 = vpop.xlane.xlu0 %220 }
 0x18e   : > { %v222_v8 = vmul.f32 0.03125, %v221_v7 }
 0x190   : > { %v223_v9 = vadd.f32 1e-05, %v222_v8 }
 0x192   : > { %431 = vrsqrt.f32 %v223_v9 }
 0x19c   : > { %v432_v10 = vpop.eup %431 }
 0x19d   : > { %v225_v12 = vmul.f32 %v432_v10, %v217_v4 }
 0x19f   : > { %v233_v14 = vmul.f32 %v358_v11, %v225_v12 }
 0x1a1   : > { %v241_v15 = vadd.f32 %v359_v13, %v233_v14 }
 0x1a3   : > { %242 = vst.msk [vmem:[%s210_s20] sm:$0xff] %vm212_vm0, %v241_v15 }
 0x1a4   : > { %532 = shalt.err (!%p529_p7)
}
 0x1a5   : > { %s533_s10 = scalar_lea.hbm %s799_s30, 128  ;;  %s537_s21 = scalar_lea.hbm %s847_s3, 256 }
 0x1a6   : > { %p534_p10 = scmp.ne.s32.totalorder %s799_s30, %s533_s10  ;;  %p538_p0 = scmp.lt.u32.totalorder %s799_s30, %s847_s3 }
 0x1a7   : > { %p539_p9 = scmp.lt.u32.totalorder %s537_s21, %s533_s10  ;;  %p541_p2 = scmp.lt.u32.totalorder %s533_s10, %s799_s30 }
 0x1a8   : > { %p535_p13 = pnand %p534_p10, %p735_p6 }
 0x1a9   : > { %p540_p11 = por %p539_p9, %p538_p0 }
 0x1aa   : > { %p536_p5 = pneg %p535_p13 }
 0x1ab   : > { %p542_p1 = por %p541_p2, %p540_p11 }
 0x1ad   : > { %p543_p4 = pnand %p542_p1, %p536_p5 }
 0x1af   : > { %546 = shalt.err (!%p543_p4)
}
 0x1b0   : > { %374 = dma.vmem_to_hbm [thread:$0]  (%p735_p6), %s801_s24, 128, %s799_s30, %s244_s5  }
 0x1b1 PF: > { %s269_s4 = sand.u32 1, %s577_s12   ;;  %p862_p8 = scmp.ne.s32.totalorder %s852_s19, 0 }
 0x1b2   : > { %p863_p12 = scmp.ge.s32.totalorder %s589_s15, 2  ;;  %s270_s22 = scalar_lea.sflag [#allocation4], %s269_s4 }
 0x1b4   : > { %p388_p3 = pnand %p863_p12, %p862_p8 }
 0x1b6   : > { %572 = dma.done.wait (!%p388_p3), %s270_s22, 128  }
 0x1b7   : > { %574 = vsyncadd (!%p388_p3), %s270_s22, 4294967168  ;;  %p17_p7 = scmp.ge.s32.totalorder %s671_s26, 4   ;;  %s864_s12 = smov %s581_s13 }
 0x1b8   : > { %s865_s13 = smov %s585_s14  ;;  %s866_s14 = smov %s731_s25 }
 0x1b9   : > { %s867_s15 = smov %s671_s26  ;;  %19 = sbr.rel (!%p17_p7) target bundleno = 6 (0x6), region = 85 }
 0x1c0   :  { %275 = vsyncpa [#allocation3], 1 }
 0x1c1   :  { %277 = vsyncpa [#allocation3 + $0x1], 1 }
 0x1c2   :  { %278 = vsyncpa [#allocation6], 1 }
 0x1c3   :  { %279 = vsyncpa [#allocation4], 1 }
 0x1c4   :  { %281 = vsyncpa [#allocation4 + $0x1], 1 }

</bundles_post_ra>
